<compile_context>
chip_gen: v7x
topology: tpu7x:2x2x1
jax: 0.10.0
libtpu: 0.0.40
codegen_flags: <defaults>
</compile_context>

<pallas_src>
import functools

import jax
import jax.numpy as jnp
from jax import lax
from jax.experimental import pallas as pl
from jax.experimental.pallas import tpu as pltpu


HIDDEN = 128            # hidden_dim of the PyTorch module
TILE_B_MAX = 2048       # per review: sweep 512/1024/2048; multiple of 256
SINGLE_STEP_MAX = 256   # below this, one grid step (step overhead not worth it)


def _round_up(x, m):
    return ((x + m - 1) // m) * m


def _choose_tile_b(B):
    if B <= SINGLE_STEP_MAX:
        return B
    # >= 2 grid steps so v7x's two TensorCores both get work; tile mult. of 256.
    return min(TILE_B_MAX, _round_up(pl.cdiv(B, 2), 256))


def _default_fuse_l2():
    """Fused block-diagonal layer-2 on 256x256-MXU chips (v6e/v7x); two
    separate 128-wide matmuls on 128x128-MXU chips (v4/v5)."""
    try:
        kind = jax.devices()[0].device_kind.lower()
    except Exception:
        return True
    return not ("v5" in kind or "v4" in kind)


def _critic_kernel(fuse_l2, hidden_dim, matmul_dtype,
                   s_ref, a_ref, ws_ref, wa_ref, w2_ref, w3_ref,
                   b_ref, b3_ref, q_ref):
    H = hidden_dim
    cdt = matmul_dtype
    f32 = jnp.float32

    # Layer 1, both Q heads fused along N: [x@W1 | x@qW1], computed as
    # state@Ws + action@Wa so no [state, action] concat is ever materialized.
    h = jnp.dot(s_ref[...].astype(cdt), ws_ref[...], preferred_element_type=f32)
    h = h + jnp.dot(a_ref[...].astype(cdt), wa_ref[...],
                    preferred_element_type=f32)
    h = jnp.maximum(h + b_ref[0:1, :], 0.0)                      # (tb, 2H) f32

    if fuse_l2:
        # v6e/v7x: one (tb,2H)@(2H,2H) matmul with a block-diagonal weight.
        g = jnp.dot(h.astype(cdt), w2_ref[...], preferred_element_type=f32)
        g = jnp.maximum(g + b_ref[1:2, :], 0.0)                  # (tb, 2H)
        # Output heads fused & lane-dense: (2H,2)^T-contract -> (2, tb).
        q = lax.dot_general(w3_ref[...], g.astype(cdt),
                            dimension_numbers=(((0,), (1,)), ((), ())),
                            preferred_element_type=f32)          # (2, tb)
    else:
        # v4/v5: two 128-wide matmuls (no zero-block MXU work).
        g1 = jnp.dot(h[:, :H].astype(cdt), w2_ref[0], preferred_element_type=f32)
        g2 = jnp.dot(h[:, H:].astype(cdt), w2_ref[1], preferred_element_type=f32)
        g1 = jnp.maximum(g1 + b_ref[1:2, :H], 0.0)               # (tb, H)
        g2 = jnp.maximum(g2 + b_ref[1:2, H:], 0.0)               # (tb, H)
        q = lax.dot_general(w3_ref[:H, :], g1.astype(cdt),
                            dimension_numbers=(((0,), (1,)), ((), ())),
                            preferred_element_type=f32)
        q = q + lax.dot_general(w3_ref[H:, :], g2.astype(cdt),
                                dimension_numbers=(((0,), (1,)), ((), ())),
                                preferred_element_type=f32)      # (2, tb)

    q_ref[...] = (q + b3_ref[...]).astype(q_ref.dtype)           # row0=q1, row1=q2


def pack_params(p, state_dim, hidden_dim=HIDDEN, *,
                matmul_dtype=jnp.float32, fuse_l2=None):
    """Fuse the per-layer PyTorch-style params into a few contiguous slabs.

    matmul_dtype=jnp.bfloat16 is recommended on v6e/v7x (weights + matmul
    operands in bf16, f32 accumulation); default f32 preserves exact semantics.
    """
    if fuse_l2 is None:
        fuse_l2 = _default_fuse_l2()
    H = hidden_dim
    wdt = matmul_dtype

    # Layer 1: (in_dim, 2H) fused along N, then split rows into state/action.
    w1f = jnp.concatenate([p["w1"], p["qw1"]], axis=1)
    ws = w1f[:state_dim, :].astype(wdt)
    wa = w1f[state_dim:, :].astype(wdt)

    # Layer 2: block-diagonal (2H, 2H) when fused, stacked (2, H, H) otherwise.
    if fuse_l2:
        zHH = jnp.zeros((H, H), jnp.float32)
        w2 = jnp.concatenate(
            [jnp.concatenate([p["w2"], zHH], axis=1),
             jnp.concatenate([zHH, p["qw2"]], axis=1)], axis=0).astype(wdt)
    else:
        w2 = jnp.stack([p["w2"], p["qw2"]], axis=0).astype(wdt)

    # Output heads: block-diagonal (2H, 2).
    zH1 = jnp.zeros((H, 1), jnp.float32)
    w3 = jnp.concatenate(
        [jnp.concatenate([p["w3"], zH1], axis=1),
         jnp.concatenate([zH1, p["qw3"]], axis=1)], axis=0).astype(wdt)

    # Layer-1/2 biases in one (2, 2H) f32 slab; output biases as a (2, 1)
    # column so they broadcast along the lane (batch) axis of the (2, tb) q.
    b12 = jnp.concatenate(
        [jnp.concatenate([p["b1"], p["qb1"]], axis=1),
         jnp.concatenate([p["b2"], p["qb2"]], axis=1)], axis=0).astype(jnp.float32)
    b3 = jnp.concatenate([p["b3"], p["qb3"]], axis=0).reshape(2, 1).astype(jnp.float32)

    return {"ws": ws, "wa": wa, "w2": w2, "w3": w3, "b12": b12, "b3": b3,
            "fuse_l2": bool(fuse_l2)}


def critic_forward(state, action, packed, *, hidden_dim=HIDDEN):
    B, state_dim = state.shape
    action_dim = action.shape[1]
    H = hidden_dim
    H2 = 2 * H
    fuse_l2 = packed["fuse_l2"]
    mdt = packed["ws"].dtype

    tile_b = _choose_tile_b(B)
    grid = (pl.cdiv(B, tile_b),)
    # Output allocated rounded up so its writeback is never ragged; inputs are
    # NOT padded/copied — Pallas clamps the last input block's DMA at B.
    Bp = grid[0] * tile_b

    if fuse_l2:
        w2_spec = pl.BlockSpec((H2, H2), lambda i: (0, 0))
        l2_flops = 2 * B * H2 * H2
    else:
        w2_spec = pl.BlockSpec((2, H, H), lambda i: (0, 0, 0))
        l2_flops = 2 * B * 2 * H * H

    in_dim = state_dim + action_dim
    param_bytes = sum(int(packed[k].size) * packed[k].dtype.itemsize
                      for k in ("ws", "wa", "w2", "w3", "b12", "b3"))
    cost = pl.CostEstimate(
        flops=2 * B * in_dim * H2 + l2_flops + 2 * B * H2 * 2,
        transcendentals=0,
        bytes_accessed=param_bytes + 4 * B * (in_dim + 2),
    )

    kernel = functools.partial(_critic_kernel, fuse_l2, H, mdt)

    q = pl.pallas_call(
        kernel,
        out_shape=jax.ShapeDtypeStruct((2, Bp), jnp.float32),
        grid=grid,
        in_specs=[
            pl.BlockSpec((tile_b, state_dim), lambda i: (i, 0)),   # state
            pl.BlockSpec((tile_b, action_dim), lambda i: (i, 0)),  # action
            pl.BlockSpec((state_dim, H2), lambda i: (0, 0)),       # Ws
            pl.BlockSpec((action_dim, H2), lambda i: (0, 0)),      # Wa
            w2_spec,                                               # W2
            pl.BlockSpec((H2, 2), lambda i: (0, 0)),               # W3 (blockdiag)
            pl.BlockSpec((2, H2), lambda i: (0, 0)),               # b1|b2
            pl.BlockSpec((2, 1), lambda i: (0, 0)),                # b3 column
        ],
        out_specs=pl.BlockSpec((2, tile_b), lambda i: (0, i)),     # lane-dense
        compiler_params=pltpu.CompilerParams(
            dimension_semantics=("parallel",)),
        cost_estimate=cost,
    )(state, action, packed["ws"], packed["wa"], packed["w2"],
      packed["w3"], packed["b12"], packed["b3"])

    q = q[:, :B]                       # drop rounded-up padding columns
    return q[0:1, :].T, q[1:2, :].T    # (B, 1) each: q1, q2


def init_params(key, state_dim, action_dim, hidden_dim=HIDDEN):
    """Mirrors the PyTorch module: weights ~ Normal(0, 0.1); biases keep the
    default nn.Linear U(-1/sqrt(fan_in), 1/sqrt(fan_in)) init.
    Weights are stored as (in_features, out_features)."""
    in_dim = state_dim + action_dim
    keys = jax.random.split(key, 12)

    def w(k, fan_in, fan_out):
        return (0.1 * jax.random.normal(k, (fan_in, fan_out))).astype(jnp.float32)

    def b(k, fan_in, fan_out):
        bound = 1.0 / jnp.sqrt(jnp.float32(fan_in))
        return jax.random.uniform(k, (1, fan_out), minval=-bound,
                                  maxval=bound).astype(jnp.float32)

    return {
        "w1": w(keys[0], in_dim, hidden_dim),     "b1": b(keys[1], in_dim, hidden_dim),
        "w2": w(keys[2], hidden_dim, hidden_dim), "b2": b(keys[3], hidden_dim, hidden_dim),
        "w3": w(keys[4], hidden_dim, 1),          "b3": b(keys[5], hidden_dim, 1),
        "qw1": w(keys[6], in_dim, hidden_dim),    "qb1": b(keys[7], in_dim, hidden_dim),
        "qw2": w(keys[8], hidden_dim, hidden_dim),"qb2": b(keys[9], hidden_dim, hidden_dim),
        "qw3": w(keys[10], hidden_dim, 1),        "qb3": b(keys[11], hidden_dim, 1),
    }


def reference_forward(state, action, params):
    x = jnp.concatenate([state, action], axis=1)
    h = jax.nn.relu(x @ params["w1"] + params["b1"])
    h = jax.nn.relu(h @ params["w2"] + params["b2"])
    q1 = h @ params["w3"] + params["b3"]
    g = jax.nn.relu(x @ params["qw1"] + params["qb1"])
    g = jax.nn.relu(g @ params["qw2"] + params["qb2"])
    q2 = g @ params["qw3"] + params["qb3"]
    return q1, q2


if __name__ == "__main__":
    STATE_DIM, ACTION_DIM = 8, 4

    key = jax.random.PRNGKey(0)
    k_s, k_a, k_p, k_s2, k_a2 = jax.random.split(key, 5)
    params = init_params(k_p, STATE_DIM, ACTION_DIM, HIDDEN)

    # --- small batch, exact f32 path (both layer-2 variants) -----------------
    B = 4
    state = jax.random.normal(k_s, (B, STATE_DIM), dtype=jnp.float32)
    action = jax.random.normal(k_a, (B, ACTION_DIM), dtype=jnp.float32)
    r1, r2 = reference_forward(state, action, params)

    for fuse in (True, False):
        packed = pack_params(params, STATE_DIM, HIDDEN, fuse_l2=fuse)
        q1, q2 = critic_forward(state, action, packed)
        q1 = jax.block_until_ready(q1)
        q2 = jax.block_until_ready(q2)
        assert q1.shape == (B, 1) and q2.shape == (B, 1)
        assert jnp.allclose(q1, r1, atol=1e-4, rtol=1e-4)
        assert jnp.allclose(q2, r2, atol=1e-4, rtol=1e-4)

    # --- bf16 MXU-operand path (review recommendation for v6e/v7x) -----------
    packed_bf16 = pack_params(params, STATE_DIM, HIDDEN,
                              matmul_dtype=jnp.bfloat16)
    q1, q2 = critic_forward(state, action, packed_bf16)
    q1 = jax.block_until_ready(q1)
    q2 = jax.block_until_ready(q2)
    assert jnp.allclose(q1, r1, atol=3e-2, rtol=3e-2)
    assert jnp.allclose(q2, r2, atol=3e-2, rtol=3e-2)

    # --- mid-size ragged batch: >=2 grid steps, no wrapper-side padding ------
    B2 = 600   # tile_b = 512 -> grid = 2 (uses both v7x TCs), ragged last block
    state2 = jax.random.normal(k_s2, (B2, STATE_DIM), dtype=jnp.float32)
    action2 = jax.random.normal(k_a2, (B2, ACTION_DIM), dtype=jnp.float32)
    packed = pack_params(params, STATE_DIM, HIDDEN)   # f32, chip-auto layer-2
    q1, q2 = critic_forward(state2, action2, packed)
    q1 = jax.block_until_ready(q1)
    q2 = jax.block_until_ready(q2)
    r1b, r2b = reference_forward(state2, action2, params)
    assert q1.shape == (B2, 1) and q2.shape == (B2, 1)
    assert jnp.allclose(q1, r1b, atol=1e-4, rtol=1e-4)
    assert jnp.allclose(q2, r2b, atol=1e-4, rtol=1e-4)

    print("KERNEL_OK")
</pallas_src>

<mosaic_0001>
module attributes {stable_mosaic.version = 11 : i64} {
  func.func @_critic_kernel(%arg0: i32, %arg1: memref<4x8xf32, #tpu.memory_space<vmem>>, %arg2: memref<4x4xf32, #tpu.memory_space<vmem>>, %arg3: memref<8x256xf32, #tpu.memory_space<vmem>>, %arg4: memref<4x256xf32, #tpu.memory_space<vmem>>, %arg5: memref<256x256xf32, #tpu.memory_space<vmem>>, %arg6: memref<256x2xf32, #tpu.memory_space<vmem>>, %arg7: memref<2x256xf32, #tpu.memory_space<vmem>>, %arg8: memref<2x1xf32, #tpu.memory_space<vmem>>, %arg9: memref<2x4xf32, #tpu.memory_space<vmem>>) attributes {dimension_semantics = [#tpu.dimension_semantics<parallel>], iteration_bounds = array<i64: 1>, scalar_prefetch = 0 : i64, scratch_operands = 0 : i64, tpu.core_type = #tpu.core_type<tc>, window_params = [{transform_indices = @transform_0, window_bounds = array<i64: 4, 8>}, {transform_indices = @transform_1, window_bounds = array<i64: 4, 4>}, {pipeline_mode = #tpu.pipeline_mode<synchronous>, transform_indices = @transform_2, window_bounds = array<i64: 8, 256>}, {pipeline_mode = #tpu.pipeline_mode<synchronous>, transform_indices = @transform_3, window_bounds = array<i64: 4, 256>}, {pipeline_mode = #tpu.pipeline_mode<synchronous>, transform_indices = @transform_4, window_bounds = array<i64: 256, 256>}, {pipeline_mode = #tpu.pipeline_mode<synchronous>, transform_indices = @transform_5, window_bounds = array<i64: 256, 2>}, {pipeline_mode = #tpu.pipeline_mode<synchronous>, transform_indices = @transform_6, window_bounds = array<i64: 2, 256>}, {pipeline_mode = #tpu.pipeline_mode<synchronous>, transform_indices = @transform_7, window_bounds = array<i64: 2, 1>}, {transform_indices = @transform_8, window_bounds = array<i64: 2, 4>}]} {
    %c0 = arith.constant 0 : index
    %c0_0 = arith.constant 0 : index
    %0 = vector.load %arg1[%c0, %c0_0] : memref<4x8xf32, #tpu.memory_space<vmem>>, vector<4x8xf32>
    %c0_1 = arith.constant 0 : index
    %c0_2 = arith.constant 0 : index
    %1 = vector.load %arg3[%c0_1, %c0_2] : memref<8x256xf32, #tpu.memory_space<vmem>>, vector<8x256xf32>
    %cst = arith.constant dense<0.000000e+00> : vector<4x256xf32>
    %2 = tpu.matmul %0, %1, %cst {dimension_numbers = #tpu.dot_dimension_numbers<[1], [0], [0], [1], [0, 0, 1, 1], [], []>} : vector<4x8xf32>, vector<8x256xf32>, vector<4x256xf32> -> vector<4x256xf32>
    %c0_3 = arith.constant 0 : index
    %c0_4 = arith.constant 0 : index
    %3 = vector.load %arg2[%c0_3, %c0_4] : memref<4x4xf32, #tpu.memory_space<vmem>>, vector<4x4xf32>
    %c0_5 = arith.constant 0 : index
    %c0_6 = arith.constant 0 : index
    %4 = vector.load %arg4[%c0_5, %c0_6] : memref<4x256xf32, #tpu.memory_space<vmem>>, vector<4x256xf32>
    %cst_7 = arith.constant dense<0.000000e+00> : vector<4x256xf32>
    %5 = tpu.matmul %3, %4, %cst_7 {dimension_numbers = #tpu.dot_dimension_numbers<[1], [0], [0], [1], [0, 0, 1, 1], [], []>} : vector<4x4xf32>, vector<4x256xf32>, vector<4x256xf32> -> vector<4x256xf32>
    %6 = arith.addf %2, %5 : vector<4x256xf32>
    %c0_8 = arith.constant 0 : index
    %c0_9 = arith.constant 0 : index
    %7 = vector.load %arg7[%c0_8, %c0_9] : memref<2x256xf32, #tpu.memory_space<vmem>>, vector<1x256xf32>
    %8 = vector.broadcast %7 : vector<1x256xf32> to vector<4x256xf32>
    %9 = arith.addf %6, %8 : vector<4x256xf32>
    %cst_10 = arith.constant 0.000000e+00 : f32
    %10 = vector.broadcast %cst_10 : f32 to vector<4x256xf32>
    %11 = arith.maximumf %9, %10 : vector<4x256xf32>
    %c0_11 = arith.constant 0 : index
    %c0_12 = arith.constant 0 : index
    %12 = vector.load %arg5[%c0_11, %c0_12] : memref<256x256xf32, #tpu.memory_space<vmem>>, vector<256x256xf32>
    %cst_13 = arith.constant dense<0.000000e+00> : vector<4x256xf32>
    %13 = tpu.matmul %11, %12, %cst_13 {dimension_numbers = #tpu.dot_dimension_numbers<[1], [0], [0], [1], [0, 0, 1, 1], [], []>} : vector<4x256xf32>, vector<256x256xf32>, vector<4x256xf32> -> vector<4x256xf32>
    %c1 = arith.constant 1 : index
    %c0_14 = arith.constant 0 : index
    %14 = vector.load %arg7[%c1, %c0_14] : memref<2x256xf32, #tpu.memory_space<vmem>>, vector<1x256xf32>
    %15 = vector.broadcast %14 : vector<1x256xf32> to vector<4x256xf32>
    %16 = arith.addf %13, %15 : vector<4x256xf32>
    %cst_15 = arith.constant 0.000000e+00 : f32
    %17 = vector.broadcast %cst_15 : f32 to vector<4x256xf32>
    %18 = arith.maximumf %16, %17 : vector<4x256xf32>
    %c0_16 = arith.constant 0 : index
    %c0_17 = arith.constant 0 : index
    %19 = vector.load %arg6[%c0_16, %c0_17] : memref<256x2xf32, #tpu.memory_space<vmem>>, vector<256x2xf32>
    %cst_18 = arith.constant dense<0.000000e+00> : vector<2x4xf32>
    %20 = tpu.matmul %19, %18, %cst_18 {dimension_numbers = #tpu.dot_dimension_numbers<[0], [1], [1], [0], [0, 1, 1, 0], [], []>} : vector<256x2xf32>, vector<4x256xf32>, vector<2x4xf32> -> vector<2x4xf32>
    %c0_19 = arith.constant 0 : index
    %c0_20 = arith.constant 0 : index
    %21 = vector.load %arg8[%c0_19, %c0_20] : memref<2x1xf32, #tpu.memory_space<vmem>>, vector<2x1xf32>
    %22 = vector.broadcast %21 : vector<2x1xf32> to vector<2x4xf32>
    %23 = arith.addf %20, %22 : vector<2x4xf32>
    %c0_21 = arith.constant 0 : index
    %c0_22 = arith.constant 0 : index
    %24 = vector.load %arg9[%c0_21, %c0_22] : memref<2x4xf32, #tpu.memory_space<vmem>>, vector<2x4xf32>
    tpu.vector_store %arg9[%c0_21, %c0_22], %23 {strides = array<i32>} : memref<2x4xf32, #tpu.memory_space<vmem>>, vector<2x4xf32>,
    return
  }
  func.func @transform_0(%arg0: i32) -> (i32, i32) {
    %c0_i32 = arith.constant 0 : i32
    %c0_i32_0 = arith.constant 0 : i32
    return %arg0, %c0_i32 : i32, i32
  }
  func.func @transform_1(%arg0: i32) -> (i32, i32) {
    %c0_i32 = arith.constant 0 : i32
    %c0_i32_0 = arith.constant 0 : i32
    return %arg0, %c0_i32 : i32, i32
  }
  func.func @transform_2(%arg0: i32) -> (i32, i32) {
    %c0_i32 = arith.constant 0 : i32
    %c0_i32_0 = arith.constant 0 : i32
    %c0_i32_1 = arith.constant 0 : i32
    return %c0_i32, %c0_i32_0 : i32, i32
  }
  func.func @transform_3(%arg0: i32) -> (i32, i32) {
    %c0_i32 = arith.constant 0 : i32
    %c0_i32_0 = arith.constant 0 : i32
    %c0_i32_1 = arith.constant 0 : i32
    return %c0_i32, %c0_i32_0 : i32, i32
  }
  func.func @transform_4(%arg0: i32) -> (i32, i32) {
    %c0_i32 = arith.constant 0 : i32
    %c0_i32_0 = arith.constant 0 : i32
    %c0_i32_1 = arith.constant 0 : i32
    return %c0_i32, %c0_i32_0 : i32, i32
  }
  func.func @transform_5(%arg0: i32) -> (i32, i32) {
    %c0_i32 = arith.constant 0 : i32
    %c0_i32_0 = arith.constant 0 : i32
    %c0_i32_1 = arith.constant 0 : i32
    return %c0_i32, %c0_i32_0 : i32, i32
  }
  func.func @transform_6(%arg0: i32) -> (i32, i32) {
    %c0_i32 = arith.constant 0 : i32
    %c0_i32_0 = arith.constant 0 : i32
    %c0_i32_1 = arith.constant 0 : i32
    return %c0_i32, %c0_i32_0 : i32, i32
  }
  func.func @transform_7(%arg0: i32) -> (i32, i32) {
    %c0_i32 = arith.constant 0 : i32
    %c0_i32_0 = arith.constant 0 : i32
    %c0_i32_1 = arith.constant 0 : i32
    return %c0_i32, %c0_i32_0 : i32, i32
  }
  func.func @transform_8(%arg0: i32) -> (i32, i32) {
    %c0_i32 = arith.constant 0 : i32
    %c0_i32_0 = arith.constant 0 : i32
    return %c0_i32, %arg0 : i32, i32
  }
}

</mosaic_0001>

<bundles_post_ra>
// kernel: tpu_custom_call.1
= control target key start
LH: loop header
LB: loop body
LE: loop exit
PB: predicated region body
PF: predicated region fallthrough
CT: control target
= control target key end

     0   :  { %13 = vsyncpa [#allocation3], 0  ;;  %s921_s0 = inlined_call_operand.vmem [shape: f32[4,8], index: 0, kind: input, shape index: {}]   ;;  %s922_s1 = inlined_call_operand.vmem [shape: f32[4,4], index: 1, kind: input, shape index: {}]   ;;  %s923_s2 = inlined_call_operand.vmem [shape: f32[8,256], index: 2, kind: input, shape index: {}]   ;;  %s924_s3 = inlined_call_operand.vmem [shape: f32[4,256], index: 3, kind: input, shape index: {}]   ;;  %s925_s4 = inlined_call_operand.hbm [shape: f32[256,256], index: 4, kind: input, shape index: {}]   ;;  %s926_s5 = inlined_call_operand.vmem [shape: f32[256,2], index: 5, kind: input, shape index: {}]   ;;  %s927_s6 = inlined_call_operand.vmem [shape: f32[2,256], index: 6, kind: input, shape index: {}]   ;;  %s928_s7 = inlined_call_operand.vmem [shape: f32[2,1], index: 7, kind: input, shape index: {}]   ;;  %s929_s8 = inlined_call_operand.hbm [shape: f32[2,4], index: 8, kind: output, shape index: {}]  }
   0x1   :  { %14 = vsyncpa [#allocation4], 0  ;;  %s726_s27 = smov [#allocation2]   ;;  %s678_s9 = scalar_lea.hbm %s925_s4, 8192 }
   0x2   :  { %s28_s28 = sshll.u32 %s726_s27, 4  ;;  %p679_p0 = scmp.ne.s32.totalorder %s925_s4, %s678_s9  ;;  %s29_s28 = int_to_ptr.vmem [resolvable:$true] %s28_s28 }
   0x3   :  { %p682_p1 = scmp.lt.u32.totalorder %s678_s9, %s925_s4 }
   0x5   :  { %p684_p2 = pnand %p682_p1, %p679_p0 }
   0x7   :  { %687 = shalt.err (!%p684_p2)
}
   0x8   :  { %s688_s14 = scalar_lea.vmem %s29_s28, 8192  ;;  %p693_p4 = scmp.lt.s32.totalorder %s29_s28, %s29_s28 }
   0x9   :  { %p689_p3 = scmp.ne.s32.totalorder %s29_s28, %s688_s14  ;;  %p694_p5 = scmp.lt.s32.totalorder %s688_s14, %s688_s14 }
   0xb   :  { %p695_p6 = por %p694_p5, %p693_p4 }
   0xd   :  { %p696_p7 = pnand %p695_p6, %p689_p3 }
   0xf   :  { %699 = shalt.err (!%p696_p7)
}
  0x10   :  { %s727_s15 = smov 256   ;;  %s728_s16 = smov 16  }
  0x11   :  { %34 = dma.hbm_to_vmem [thread:$0]  %s925_s4, 8192, %s29_s28, [#allocation3], %s727_s15, %s727_s15, %s728_s16  }
  0x12   :  { %722 = dma.done.wait [#allocation3], 8192  }
  0x13   :  { %723 = vsyncadd [#allocation3], 4294959104  ;;  %v729_v0 = vmov 0.0   ;;  %v48_v1 = vld [vmem:[%s924_s3] sm:$0xff]  ;;  %vm55_vm0 = vcmask 1043456   ;;  %v46_v4 = vld [vmem:[%s923_s2 + $0x8] sm:$0xff] }
  0x14   :  { %124 = vmatprep.mubr.f32.mxu0 %v729_v0  ;;  %v50_v2 = vcombine.high %v48_v1, %v48_v1  ;;  %v47_v3 = vld [vmem:[%s922_s1] sm:$0xf]  ;;  %v223_v5 = vld [vmem:[#allocation2 + $0x8] sm:$0xff]  ;;  %vm51_vm1 = vcmask 31744   ;;  %v225_v6 = vld [vmem:[#allocation2 + $0x18] sm:$0xff]  ;;  %vm131_vm2 = vcmask 64512  }
  0x15   :  { %v222_v7 = vld [vmem:[#allocation2] sm:$0xff]  ;;  %v224_v8 = vld [vmem:[#allocation2 + $0x10] sm:$0xff]  ;;  %v566_v10 = vpack.c.bf16 %v225_v6, %v223_v5  ;;  %v227_v11 = vld [vmem:[#allocation2 + $0x28] sm:$0xff]  ;;  %vm544_vm3 = vcmask 25600  }
  0x16   :  { %561 = vmatprep.subr.msk.mxu0 %vm55_vm0, %v50_v2  ;;  %v45_v9 = vld [vmem:[%s923_s2] sm:$0xff]  ;;  %v229_v12 = vld [vmem:[#allocation2 + $0x38] sm:$0xff]  ;;  %v568_v13 = vpack.c.bf16 %v224_v8, %v222_v7  ;;  %v228_v16 = vld [vmem:[#allocation2 + $0x30] sm:$0xff] }
  0x17   :  { %562 = vmatpush1.msk.msra.mxu0 %vm55_vm0, %v48_v1  ;;  %v570_v14 = vpack.c.bf16 %v229_v12, %v227_v11  ;;  %v226_v15 = vld [vmem:[#allocation2 + $0x20] sm:$0xff]  ;;  %v231_v17 = vld [vmem:[#allocation2 + $0x48] sm:$0xff]  ;;  %v233_v18 = vld [vmem:[#allocation2 + $0x58] sm:$0xff]  ;;  %567 = vmatprep.subr.bf16.mxu1 %v566_v10 }
  0x18   :  { %563 = vmatmul.mubr.msk.f32.vlgmr.msra.gmra.mrb[0].mxu0 %vm51_vm1, %v47_v3  ;;  %135 = vmatprep.subr.mxu0 %v46_v4  ;;  %v572_v19 = vpack.c.bf16 %v228_v16, %v226_v15  ;;  %v574_v20 = vpack.c.bf16 %v233_v18, %v231_v17  ;;  %v230_v21 = vld [vmem:[#allocation2 + $0x40] sm:$0xff]  ;;  %v232_v22 = vld [vmem:[#allocation2 + $0x50] sm:$0xff]  ;;  %v235_v24 = vld [vmem:[#allocation2 + $0x68] sm:$0xff] }
  0x19   :  { %136 = vmatpush1.msra.mxu0 %v45_v9  ;;  %199 = vmatprep.mubr.f32.mxu0 %v729_v0  ;;  %v44_v23 = vld [vmem:[%s921_s0] sm:$0xf]  ;;  %v237_v25 = vld [vmem:[#allocation2 + $0x78] sm:$0xff]  ;;  %v576_v26 = vpack.c.bf16 %v232_v22, %v230_v21  ;;  %v236_v29 = vld [vmem:[#allocation2 + $0x70] sm:$0xff] }
  0x1a   :  { %569 = vmatpush1.bf16.msra.mxu1 %v568_v13  ;;  %v578_v27 = vpack.c.bf16 %v237_v25, %v235_v24  ;;  %v234_v28 = vld [vmem:[#allocation2 + $0x60] sm:$0xff]  ;;  %v239_v30 = vld [vmem:[#allocation2 + $0x88] sm:$0xff]  ;;  %v241_v31 = vld [vmem:[#allocation2 + $0x98] sm:$0xff] }
  0x1b   :  { %571 = vmatprep.subr.bf16.mxu1 %v570_v14  ;;  %v580_v32 = vpack.c.bf16 %v236_v29, %v234_v28  ;;  %v582_v33 = vpack.c.bf16 %v241_v31, %v239_v30  ;;  %v238_v34 = vld [vmem:[#allocation2 + $0x80] sm:$0xff]  ;;  %v240_v35 = vld [vmem:[#allocation2 + $0x90] sm:$0xff]  ;;  %v243_v36 = vld [vmem:[#allocation2 + $0xa8] sm:$0xff] }
  0x1c   :  { %v245_v37 = vld [vmem:[#allocation2 + $0xb8] sm:$0xff]  ;;  %v584_v38 = vpack.c.bf16 %v240_v35, %v238_v34  ;;  %v242_v40 = vld [vmem:[#allocation2 + $0xa0] sm:$0xff]  ;;  %v244_v41 = vld [vmem:[#allocation2 + $0xb0] sm:$0xff] }
  0x1d   :  { %v586_v39 = vpack.c.bf16 %v245_v37, %v243_v36  ;;  %v247_v42 = vld [vmem:[#allocation2 + $0xc8] sm:$0xff]  ;;  %v249_v43 = vld [vmem:[#allocation2 + $0xd8] sm:$0xff]  ;;  %v588_v44 = vpack.c.bf16 %v244_v41, %v242_v40  ;;  %v246_v46 = vld [vmem:[#allocation2 + $0xc0] sm:$0xff] }
  0x1e   :  { %573 = vmatpush1.bf16.msra.mxu1 %v572_v19  ;;  %v590_v45 = vpack.c.bf16 %v249_v43, %v247_v42  ;;  %v248_v47 = vld [vmem:[#allocation2 + $0xd0] sm:$0xff]  ;;  %v251_v48 = vld [vmem:[#allocation2 + $0xe8] sm:$0xff]  ;;  %v253_v49 = vld [vmem:[#allocation2 + $0xf8] sm:$0xff] }
  0x1f   :  { %575 = vmatprep.subr.bf16.mxu1 %v574_v20  ;;  %v592_v50 = vpack.c.bf16 %v248_v47, %v246_v46  ;;  %v594_v51 = vpack.c.bf16 %v253_v49, %v251_v48  ;;  %v250_v52 = vld [vmem:[#allocation2 + $0xe0] sm:$0xff]  ;;  %v252_v53 = vld [vmem:[#allocation2 + $0xf0] sm:$0xff]  ;;  %v255_v54 = vld [vmem:[#allocation2 + $0x108] sm:$0xff] }
  0x20   :  { %564 = vmatmul.mubr.msk.f32.vlgmr.msra.gmra.mrb[0].mxu0 %vm131_vm2, %v44_v23  ;;  %v257_v55 = vld [vmem:[#allocation2 + $0x118] sm:$0xff]  ;;  %v596_v56 = vpack.c.bf16 %v252_v53, %v250_v52  ;;  %v254_v58 = vld [vmem:[#allocation2 + $0x100] sm:$0xff]  ;;  %v256_v59 = vld [vmem:[#allocation2 + $0x110] sm:$0xff] }
  0x21   :  { %v598_v57 = vpack.c.bf16 %v257_v55, %v255_v54  ;;  %v259_v60 = vld [vmem:[#allocation2 + $0x128] sm:$0xff]  ;;  %v261_v61 = vld [vmem:[#allocation2 + $0x138] sm:$0xff]  ;;  %v600_v62 = vpack.c.bf16 %v256_v59, %v254_v58  ;;  %v258_v0 = vld [vmem:[#allocation2 + $0x120] sm:$0xff] }
  0x22   :  { %577 = vmatpush1.bf16.msra.mxu1 %v576_v26  ;;  %v602_v63 = vpack.c.bf16 %v261_v61, %v259_v60  ;;  %v260_v1 = vld [vmem:[#allocation2 + $0x130] sm:$0xff]  ;;  %v263_v2 = vld [vmem:[#allocation2 + $0x148] sm:$0xff]  ;;  %v265_v3 = vld [vmem:[#allocation2 + $0x158] sm:$0xff] }
  0x23   :  { %579 = vmatprep.subr.bf16.mxu1 %v578_v27  ;;  %v604_v4 = vpack.c.bf16 %v260_v1, %v258_v0  ;;  %v606_v5 = vpack.c.bf16 %v265_v3, %v263_v2  ;;  %v262_v6 = vld [vmem:[#allocation2 + $0x140] sm:$0xff]  ;;  %v264_v7 = vld [vmem:[#allocation2 + $0x150] sm:$0xff]  ;;  %v267_v8 = vld [vmem:[#allocation2 + $0x168] sm:$0xff] }
  0x24   :  { %v269_v9 = vld [vmem:[#allocation2 + $0x178] sm:$0xff]  ;;  %v608_v10 = vpack.c.bf16 %v264_v7, %v262_v6  ;;  %v266_v12 = vld [vmem:[#allocation2 + $0x160] sm:$0xff]  ;;  %v268_v13 = vld [vmem:[#allocation2 + $0x170] sm:$0xff] }
  0x25   :  { %v610_v11 = vpack.c.bf16 %v269_v9, %v267_v8  ;;  %v271_v14 = vld [vmem:[#allocation2 + $0x188] sm:$0xff]  ;;  %v273_v15 = vld [vmem:[#allocation2 + $0x198] sm:$0xff]  ;;  %v612_v16 = vpack.c.bf16 %v268_v13, %v266_v12  ;;  %v270_v18 = vld [vmem:[#allocation2 + $0x180] sm:$0xff] }
  0x26   :  { %581 = vmatpush1.bf16.msra.mxu1 %v580_v32  ;;  %v614_v17 = vpack.c.bf16 %v273_v15, %v271_v14  ;;  %v272_v19 = vld [vmem:[#allocation2 + $0x190] sm:$0xff]  ;;  %v275_v20 = vld [vmem:[#allocation2 + $0x1a8] sm:$0xff]  ;;  %v277_v21 = vld [vmem:[#allocation2 + $0x1b8] sm:$0xff] }
  0x27   :  { %583 = vmatprep.subr.bf16.mxu1 %v582_v33  ;;  %v616_v22 = vpack.c.bf16 %v272_v19, %v270_v18  ;;  %v618_v23 = vpack.c.bf16 %v277_v21, %v275_v20  ;;  %v274_v24 = vld [vmem:[#allocation2 + $0x1a0] sm:$0xff]  ;;  %v276_v25 = vld [vmem:[#allocation2 + $0x1b0] sm:$0xff]  ;;  %v279_v26 = vld [vmem:[#allocation2 + $0x1c8] sm:$0xff] }
  0x28   :  { %v281_v27 = vld [vmem:[#allocation2 + $0x1d8] sm:$0xff]  ;;  %v620_v28 = vpack.c.bf16 %v276_v25, %v274_v24  ;;  %v278_v30 = vld [vmem:[#allocation2 + $0x1c0] sm:$0xff]  ;;  %v280_v31 = vld [vmem:[#allocation2 + $0x1d0] sm:$0xff] }
  0x29   :  { %v622_v29 = vpack.c.bf16 %v281_v27, %v279_v26  ;;  %v624_v32 = vpack.c.bf16 %v280_v31, %v278_v30  ;;  %v283_v33 = vld [vmem:[#allocation2 + $0x1e8] sm:$0xff]  ;;  %v285_v34 = vld [vmem:[#allocation2 + $0x1f8] sm:$0xff]  ;;  %v282_v36 = vld [vmem:[#allocation2 + $0x1e0] sm:$0xff] }
  0x2a   :  { %585 = vmatpush1.bf16.msra.mxu1 %v584_v38  ;;  %v626_v35 = vpack.c.bf16 %v285_v34, %v283_v33  ;;  %v284_v37 = vld [vmem:[#allocation2 + $0x1f0] sm:$0xff]  ;;  %v388_v40 = vld [vmem:[%s926_s5 + $0x80] sm:$0xff]  ;;  %v373_v41 = vld [vmem:[%s926_s5 + $0x8] sm:$0xff] }
  0x2b   :  { %587 = vmatprep.subr.bf16.mxu1 %v586_v39  ;;  %v628_v38 = vpack.c.bf16 %v284_v37, %v282_v36  ;;  %v372_v39 = vld [vmem:[%s926_s5] sm:$0xff]  ;;  %v389_v43 = vld [vmem:[%s926_s5 + $0x88] sm:$0xff]  ;;  %v390_v46 = vld [vmem:[%s926_s5 + $0x90] sm:$0xff] }
  0x2c   :  { %v638_v42 = vpack.i.bf16 %v372_v39, %v388_v40  ;;  %v375_v48 = vld [vmem:[%s926_s5 + $0x18] sm:$0xff]  ;;  %v392_v52 = vld [vmem:[%s926_s5 + $0xa0] sm:$0xff]  ;;  %v377_v54 = vld [vmem:[%s926_s5 + $0x28] sm:$0xff]  ;;  %v730_v39 = vmov 0  }
  0x2d   :  { %v391_v49 = vld [vmem:[%s926_s5 + $0x98] sm:$0xff]  ;;  %v393_v55 = vld [vmem:[%s926_s5 + $0xa8] sm:$0xff]  ;;  %v394_v58 = vld [vmem:[%s926_s5 + $0xb0] sm:$0xff]  ;;  %675 = vset.pattern.permute.xlu1 %v730_v39 }
  0x2e   :  { %589 = vmatpush1.bf16.msra.mxu1 %v588_v44  ;;  %639 = vxpose.xlu0.b32.start [1/16] (narrow) %v638_v42, 8  ;;  %v640_v44 = vpack.i.bf16 %v373_v41, %v389_v43  ;;  %v379_v60 = vld [vmem:[%s926_s5 + $0x38] sm:$0xff]  ;;  %v396_v0 = vld [vmem:[%s926_s5 + $0xc0] sm:$0xff]  ;;  %v381_v2 = vld [vmem:[%s926_s5 + $0x48] sm:$0xff] }
  0x2f   :  { %591 = vmatprep.subr.bf16.mxu1 %v590_v45  ;;  %v374_v45 = vld [vmem:[%s926_s5 + $0x10] sm:$0xff]  ;;  %v395_v61 = vld [vmem:[%s926_s5 + $0xb8] sm:$0xff]  ;;  %v397_v3 = vld [vmem:[%s926_s5 + $0xc8] sm:$0xff] }
  0x30   :  { %v642_v47 = vpack.i.bf16 %v374_v45, %v390_v46  ;;  %v398_v6 = vld [vmem:[%s926_s5 + $0xd0] sm:$0xff]  ;;  %v383_v8 = vld [vmem:[%s926_s5 + $0x58] sm:$0xff]  ;;  %v400_v12 = vld [vmem:[%s926_s5 + $0xe0] sm:$0xff] }
  0x31   :  { %v399_v9 = vld [vmem:[%s926_s5 + $0xd8] sm:$0xff]  ;;  %v385_v14 = vld [vmem:[%s926_s5 + $0x68] sm:$0xff]  ;;  %v402_v18 = vld [vmem:[%s926_s5 + $0xf0] sm:$0xff] }
  0x32   :  { %593 = vmatpush1.bf16.msra.mxu1 %v592_v50  ;;  %641 = vxpose.xlu0.b32.cont [2/16] (narrow) %v640_v44, 8  ;;  %v644_v50 = vpack.i.bf16 %v375_v48, %v391_v49  ;;  %v401_v15 = vld [vmem:[%s926_s5 + $0xe8] sm:$0xff]  ;;  %v387_v20 = vld [vmem:[%s926_s5 + $0x78] sm:$0xff]  ;;  %v206_v26 = vld [vmem:[%s927_s6] ss:$2 sm:$0x3] }
  0x33   :  { %595 = vmatprep.subr.bf16.mxu1 %v594_v51  ;;  %v376_v51 = vld [vmem:[%s926_s5 + $0x20] sm:$0xff]  ;;  %v403_v21 = vld [vmem:[%s926_s5 + $0xf8] sm:$0xff] }
  0x34   :  { %v646_v53 = vpack.i.bf16 %v376_v51, %v392_v52  ;;  %v565_v40 = vld [vmem:[%s927_s6 + $0x1] ss:$2 sm:$0x3] }
  0x36   :  { %597 = vmatpush1.bf16.msra.mxu1 %v596_v56  ;;  %643 = vxpose.xlu0.b32.cont [3/16] (narrow) %v642_v47, 8  ;;  %v648_v56 = vpack.i.bf16 %v377_v54, %v393_v55 }
  0x37   :  { %599 = vmatprep.subr.bf16.mxu1 %v598_v57  ;;  %v378_v57 = vld [vmem:[%s926_s5 + $0x30] sm:$0xff] }
  0x38   :  { %v650_v59 = vpack.i.bf16 %v378_v57, %v394_v58 }
  0x3a   :  { %601 = vmatpush1.bf16.msra.mxu1 %v600_v62  ;;  %645 = vxpose.xlu0.b32.cont [4/16] (narrow) %v644_v50, 8  ;;  %v652_v62 = vpack.i.bf16 %v379_v60, %v395_v61 }
  0x3b   :  { %603 = vmatprep.subr.bf16.mxu1 %v602_v63  ;;  %v380_v63 = vld [vmem:[%s926_s5 + $0x40] sm:$0xff] }
  0x3c   :  { %v654_v1 = vpack.i.bf16 %v380_v63, %v396_v0 }
  0x3e   :  { %605 = vmatpush1.bf16.msra.mxu1 %v604_v4  ;;  %647 = vxpose.xlu0.b32.cont [5/16] (narrow) %v646_v53, 8  ;;  %v656_v4 = vpack.i.bf16 %v381_v2, %v397_v3 }
  0x3f   :  { %607 = vmatprep.subr.bf16.mxu1 %v606_v5  ;;  %v382_v5 = vld [vmem:[%s926_s5 + $0x50] sm:$0xff] }
  0x40   :  { %v658_v7 = vpack.i.bf16 %v382_v5, %v398_v6 }
  0x42   :  { %609 = vmatpush1.bf16.msra.mxu1 %v608_v10  ;;  %649 = vxpose.xlu0.b32.cont [6/16] (narrow) %v648_v56, 8  ;;  %v660_v10 = vpack.i.bf16 %v383_v8, %v399_v9 }
  0x43   :  { %611 = vmatprep.subr.bf16.mxu1 %v610_v11  ;;  %v384_v11 = vld [vmem:[%s926_s5 + $0x60] sm:$0xff] }
  0x44   :  { %v662_v13 = vpack.i.bf16 %v384_v11, %v400_v12 }
  0x46   :  { %613 = vmatpush1.bf16.msra.mxu1 %v612_v16  ;;  %651 = vxpose.xlu0.b32.cont [7/16] (narrow) %v650_v59, 8  ;;  %v664_v16 = vpack.i.bf16 %v385_v14, %v401_v15 }
  0x47   :  { %615 = vmatprep.subr.bf16.mxu1 %v614_v17  ;;  %v386_v17 = vld [vmem:[%s926_s5 + $0x70] sm:$0xff] }
  0x48   :  { %v666_v19 = vpack.i.bf16 %v386_v17, %v402_v18 }
  0x4a   :  { %617 = vmatpush1.bf16.msra.mxu1 %v616_v22  ;;  %653 = vxpose.xlu0.b32.cont [8/16] (narrow) %v652_v62, 8  ;;  %v668_v22 = vpack.i.bf16 %v387_v20, %v403_v21 }
  0x4b   :  { %619 = vmatprep.subr.bf16.mxu1 %v618_v23  ;;  %v208_v23 = vlaneseq }
  0x4d   :  { %v209_v24 = vshrl.u32 %v208_v23, 7 }
  0x4e   :  { %621 = vmatpush1.bf16.msra.mxu1 %v620_v28  ;;  %655 = vxpose.xlu0.b32.cont [9/16] (narrow) %v654_v1, 8 }
  0x4f   :  { %623 = vmatprep.subr.bf16.mxu1 %v622_v29  ;;  %v210_v25 = vsub.s32 0, %v209_v24  ;;  %v214_v27 = vsub.s32 1, %v209_v24 }
  0x51   :  { %v211_v28 = vrot.slane %v206_v26, %v210_v25  ;;  %v215_v29 = vrot.slane %v206_v26, %v214_v27  ;;  %v292_v41 = vrot.slane %v565_v40, %v210_v25  ;;  %v296_v42 = vrot.slane %v565_v40, %v214_v27 }
  0x52   :  { %625 = vmatpush1.bf16.msra.mxu1 %v624_v32  ;;  %657 = vxpose.xlu0.b32.cont [10/16] (narrow) %v656_v4, 8 }
  0x53   :  { %627 = vmatprep.subr.bf16.mxu1 %v626_v35 }
  0x56   :  { %629 = vmatpush1.bf16.msra.mxu1 %v628_v38  ;;  %659 = vxpose.xlu0.b32.cont [11/16] (narrow) %v658_v7, 8  ;;  %v404_v38 = vld [vmem:[%s928_s7] sm:$0x3]  ;;  %s731_s7 = smov [#allocation5]  }
  0x57   :  { %407 = vperm.xlu1 %675, %v404_v38   ;;  %s552_s17 = sshll.u32 %s731_s7, 4  ;;  %s553_s17 = int_to_ptr.vmem [resolvable:$true] %s552_s17 }
  0x58   :  { %s700_s6 = scalar_lea.vmem %s553_s17, 32  ;;  %p705_p9 = scmp.lt.s32.totalorder %s553_s17, %s553_s17 }
  0x59   :  { %p701_p8 = scmp.ne.s32.totalorder %s553_s17, %s700_s6  ;;  %p706_p10 = scmp.lt.s32.totalorder %s700_s6, %s700_s6 }
  0x5a   :  { %661 = vxpose.xlu0.b32.cont [12/16] (narrow) %v660_v10, 8 }
  0x5b   :  { %p707_p11 = por %p706_p10, %p705_p9 }
  0x5d   :  { %p708_p12 = pnand %p707_p11, %p701_p8 }
  0x5e   :  { %663 = vxpose.xlu0.b32.cont [13/16] (narrow) %v662_v13, 8 }
  0x62   :  { %665 = vxpose.xlu0.b32.cont [14/16] (narrow) %v664_v16, 8 }
  0x66   :  { %667 = vxpose.xlu0.b32.cont [15/16] (narrow) %v666_v19, 8 }
  0x6a   :  { %669 = vxpose.xlu0.b32.end [16/16] (narrow) %v668_v22, 8 }
  0x93   :  { %676 = vset.pattern.permute.xlu0 %v730_v39 }
  0xae   :  { %v670_v36 = vpop.trf.xlu0 }
  0xaf   :  { %v671_v37 = vunpack.i.l.bf16 %v670_v36  ;;  %v674_v49 = vunpack.i.h.bf16 %v670_v36 }
  0xb1   :  { %538 = vmatprep.mubr.f32.mxu0 %v671_v37 }
  0xd6   :  { %v408_v50 = vpop.permute.xlu1 %407 }
  0xf3   :  { %v201_v30 = vpop.f32.mrb[0].mxu0 }
  0xf4   :  { %v218_v31 = vadd.f32 %v211_v28, %v201_v30  ;;  %v203_v32 = vpop.f32.mrb[1].mxu0 }
  0xf5   :  { %v219_v33 = vadd.f32 %v215_v29, %v203_v32 }
  0xf6   :  { %v220_v35 = vmax.f32 %v218_v31, 0.0 }
  0xf7   :  { %v221_v34 = vmax.f32 %v219_v33, 0.0 }
  0xf9   :  { %363 = vmatprep.mubr.f32.mxu1 %v221_v34 }
  0xfa   :  { %364 = vmatmul.mubr.f32.vlgmr.msra.gmra.mrb[0].mxu1 %v220_v35 }
 0x1cd   :  { %v365_v43 = vpop.f32.mrb[0].mxu1 }
 0x1ce   :  { %v366_v44 = vadd.f32 %v365_v43, %v292_v41  ;;  %v367_v45 = vpop.f32.mrb[1].mxu1 }
 0x1cf   :  { %v368_v46 = vadd.f32 %v367_v45, %v296_v42 }
 0x1d0   :  { %v370_v48 = vmax.f32 %v366_v44, 0.0 }
 0x1d1   :  { %v371_v47 = vmax.f32 %v368_v46, 0.0 }
 0x1d3   :  { %474 = vmatprep.subr.mxu0 %v371_v47 }
 0x1d4   :  { %475 = vmatpush1.xpose.msra.mxu0 %v370_v48 }
 0x1d7   :  { %539 = vmatmul.mubr.f32.vlgmr.msra.gmra.mrb[2].mxu0 %v674_v49 }
 0x2aa   :  { %v540_v51 = vpop.f32.mrb[2].mxu0 }
 0x2ab   :  { %v541_v52 = vadd.f32 %v540_v51, %v408_v50  ;;  %v542_v53 = vpop.f32.mrb[3].mxu0 }
 0x2ad   :  { %545 = vst.msk [vmem:[#allocation5] sm:$0x3] %vm544_vm3, %v541_v52 }
 0x2ae   :  { %711 = shalt.err (!%p708_p12)
}
 0x2af   :  { %s712_s20 = scalar_lea.hbm %s929_s8, 32 }
 0x2b0   :  { %p713_p13 = scmp.ne.s32.totalorder %s929_s8, %s712_s20  ;;  %p716_p0 = scmp.lt.u32.totalorder %s712_s20, %s929_s8 }
 0x2b2   :  { %p718_p1 = pnand %p716_p0, %p713_p13 }
 0x2b4   :  { %721 = shalt.err (!%p718_p1)
}
 0x2b5   :  { %555 = dma.vmem_to_hbm [thread:$0]  %s553_s17, 32, %s929_s8, [#allocation4]  }
 0x2b6   :  { %724 = dma.done.wait [#allocation4], 32  }
 0x2b7   :  { %725 = vsyncadd [#allocation4], 4294967264 }
 0x2b8   :  { %559 = vsyncpa [#allocation3], 1 }
 0x2b9   :  { %560 = vsyncpa [#allocation4], 1 }

</bundles_post_ra>
